<compile_context>
chip_gen: v7x
topology: tpu7x:2x2x1
jax: 0.10.0
libtpu: 0.0.40
codegen_flags: <defaults>
</compile_context>

<pallas_src>
import functools

import jax
import jax.numpy as jnp
from jax.experimental import pallas as pl
from jax.experimental.pallas import tpu as pltpu

LANES = 128
SUBLANES = 8
TARGET_TILE_ROWS = 2048   # 2048*128*4B = 1 MiB per input block
NUM_CORES = 2             # "parallel" leading grid axis (v7x megacore; serial on v5e/v6e)


def _l1_loss_kernel(thr, hr_ref, pred_ref, abs_acc_ref, relu_acc_ref):
    """Accumulate per-core partial sums of |pred-hr| and relu(|pred-hr| - thr).

    thr = 255 * softw. abs_acc_ref / relu_acc_ref are (1, 8, 128) f32 output
    blocks that stay resident across the inner ("arbitrary") grid axis.
    """
    t = pl.program_id(1)

    @pl.when(t == 0)
    def _():
        abs_acc_ref[...] = jnp.zeros_like(abs_acc_ref)
        relu_acc_ref[...] = jnp.zeros_like(relu_acc_ref)

    d = jnp.abs(pred_ref[...].astype(jnp.float32) - hr_ref[...].astype(jnp.float32))
    r = jnp.maximum(d - jnp.float32(thr), jnp.float32(0.0))

    # (tile_rows, 128) -> (tile_rows//8, 8, 128); reduce leading axis = VPU adds only.
    partial_abs = jnp.sum(d.reshape(-1, SUBLANES, LANES), axis=0)
    partial_relu = jnp.sum(r.reshape(-1, SUBLANES, LANES), axis=0)

    abs_acc_ref[...] = abs_acc_ref[...] + partial_abs[None, :, :]
    relu_acc_ref[...] = relu_acc_ref[...] + partial_relu[None, :, :]


def l1_loss(hr_img, pred_img, seg_img=None, *, softw=0.01, c=2.0):
    """Pallas TPU implementation of L1_Loss.forward (seg_img is unused)."""
    del seg_img  # unused by the reference forward pass

    hr = hr_img.reshape(-1)
    pred = pred_img.reshape(-1)
    n = hr.shape[0]
    thr = 255.0 * float(softw)

    # Tiling: split rows across NUM_CORES, then tile each core's share.
    rows = pl.cdiv(n, LANES)
    rows_per_core = pl.cdiv(rows, NUM_CORES)
    tile_rows = min(TARGET_TILE_ROWS, pl.cdiv(rows_per_core, SUBLANES) * SUBLANES)
    tiles_per_core = pl.cdiv(rows_per_core, tile_rows)
    rows_padded = NUM_CORES * tiles_per_core * tile_rows
    pad = rows_padded * LANES - n

    if pad:  # only materialize a padded copy when the size is not aligned
        hr = jnp.pad(hr, (0, pad))
        pred = jnp.pad(pred, (0, pad))
    hr2 = hr.reshape(rows_padded, LANES)
    pred2 = pred.reshape(rows_padded, LANES)

    in_map = lambda p, t: (p * tiles_per_core + t, 0)
    out_map = lambda p, t: (p, 0, 0)

    abs_out, relu_out = pl.pallas_call(
        functools.partial(_l1_loss_kernel, thr),
        out_shape=(
            jax.ShapeDtypeStruct((NUM_CORES, SUBLANES, LANES), jnp.float32),
            jax.ShapeDtypeStruct((NUM_CORES, SUBLANES, LANES), jnp.float32),
        ),
        grid_spec=pltpu.PrefetchScalarGridSpec(
            num_scalar_prefetch=0,
            grid=(NUM_CORES, tiles_per_core),
            in_specs=[
                pl.BlockSpec((tile_rows, LANES), in_map),
                pl.BlockSpec((tile_rows, LANES), in_map),
            ],
            out_specs=[
                pl.BlockSpec((1, SUBLANES, LANES), out_map),
                pl.BlockSpec((1, SUBLANES, LANES), out_map),
            ],
        ),
        compiler_params=pltpu.CompilerParams(
            dimension_semantics=("parallel", "arbitrary")),
    )(hr2, pred2)

    sum_abs = jnp.sum(abs_out)
    # Padded zeros contribute |0|=0 to sum_abs and relu(0 - thr) = max(-thr, 0)
    # each to sum_relu; correct analytically so no in-kernel mask is needed
    # even for softw < 0.
    sum_relu = jnp.sum(relu_out) - jnp.float32(pad) * jnp.maximum(
        jnp.float32(-thr), jnp.float32(0.0))

    scale = jnp.float32(255.0) * jnp.float32(n)
    mean_abs = sum_abs / scale          # mean(tmp)
    mean_relu = sum_relu / scale        # tmp2 = mean(relu(tmp - softw))
    return jnp.where(mean_relu == 0.0, jnp.float32(c) * mean_abs, mean_abs)


def _reference(hr_img, pred_img, softw, c):
    tmp = jnp.abs(pred_img.astype(jnp.float32) - hr_img.astype(jnp.float32)) / 255.0
    tmp2 = jnp.mean(jnp.maximum(tmp - softw, 0.0))
    return jnp.where(tmp2 == 0.0, jnp.mean(c * tmp), jnp.mean(tmp))


if __name__ == "__main__":
    key = jax.random.PRNGKey(0)
    k1, k2, k3, k4 = jax.random.split(key, 4)

    softw, c = 0.01, 2.0

    # Case 1: small NCHW image-like inputs (lane-aligned size).
    B, C, H, W = 2, 4, 16, 16
    hr_img = jax.random.uniform(k1, (B, C, H, W), jnp.float32) * 255.0
    pred_img = jax.random.uniform(k2, (B, C, H, W), jnp.float32) * 255.0
    seg_img = jax.random.uniform(k3, (B, C, H, W), jnp.float32)

    loss = l1_loss(hr_img, pred_img, seg_img, softw=softw, c=c)
    jax.block_until_ready(loss)
    ref = _reference(hr_img, pred_img, softw, c)
    assert jnp.allclose(loss, ref, rtol=1e-5, atol=1e-6), (loss, ref)

    # Case 2: ragged (non-multiple-of-128) size exercising the padding path,
    # with small differences so the tmp2 == 0 (c * mean) branch is taken.
    hr_r = jax.random.uniform(k4, (3, 3, 7, 11), jnp.float32) * 255.0
    pred_r = hr_r + 0.5  # |diff|/255 < softw everywhere -> relu sum is 0
    loss_r = l1_loss(hr_r, pred_r, None, softw=softw, c=c)
    jax.block_until_ready(loss_r)
    ref_r = _reference(hr_r, pred_r, softw, c)
    assert jnp.allclose(loss_r, ref_r, rtol=1e-5, atol=1e-6), (loss_r, ref_r)

    print("KERNEL_OK")
</pallas_src>

<mosaic_0001>
module attributes {stable_mosaic.version = 11 : i64} {
  func.func @_l1_loss_kernel(%arg0: i32, %arg1: i32, %arg2: memref<8x128xf32, #tpu.memory_space<vmem>>, %arg3: memref<8x128xf32, #tpu.memory_space<vmem>>, %arg4: memref<1x8x128xf32, #tpu.memory_space<vmem>>, %arg5: memref<1x8x128xf32, #tpu.memory_space<vmem>>) attributes {dimension_semantics = [#tpu.dimension_semantics<parallel>, #tpu.dimension_semantics<arbitrary>], iteration_bounds = array<i64: 2, 1>, scalar_prefetch = 0 : i64, scratch_operands = 0 : i64, tpu.core_type = #tpu.core_type<tc>, window_params = [{transform_indices = @transform_0, window_bounds = array<i64: 8, 128>}, {transform_indices = @transform_1, window_bounds = array<i64: 8, 128>}, {transform_indices = @transform_2, window_bounds = array<i64: 1, 8, 128>}, {transform_indices = @transform_3, window_bounds = array<i64: 1, 8, 128>}]} {
    %c0_i32 = arith.constant 0 : i32
    %0 = arith.cmpi eq, %arg1, %c0_i32 : i32
    %1 = arith.extui %0 : i1 to i32
    %c0_i32_0 = arith.constant 0 : i32
    %2 = arith.cmpi ne, %1, %c0_i32_0 : i32
    scf.if %2 {
      %cst_19 = arith.constant 0.000000e+00 : f32
      %23 = vector.broadcast %cst_19 : f32 to vector<1x8x128xf32>
      %c0_20 = arith.constant 0 : index
      %c0_21 = arith.constant 0 : index
      %c0_22 = arith.constant 0 : index
      %24 = vector.load %arg4[%c0_20, %c0_21, %c0_22] : memref<1x8x128xf32, #tpu.memory_space<vmem>>, vector<1x8x128xf32>
      tpu.vector_store %arg4[%c0_20, %c0_21, %c0_22], %23 {strides = array<i32>} : memref<1x8x128xf32, #tpu.memory_space<vmem>>, vector<1x8x128xf32>,
      %cst_23 = arith.constant 0.000000e+00 : f32
      %25 = vector.broadcast %cst_23 : f32 to vector<1x8x128xf32>
      %c0_24 = arith.constant 0 : index
      %c0_25 = arith.constant 0 : index
      %c0_26 = arith.constant 0 : index
      %26 = vector.load %arg5[%c0_24, %c0_25, %c0_26] : memref<1x8x128xf32, #tpu.memory_space<vmem>>, vector<1x8x128xf32>
      tpu.vector_store %arg5[%c0_24, %c0_25, %c0_26], %25 {strides = array<i32>} : memref<1x8x128xf32, #tpu.memory_space<vmem>>, vector<1x8x128xf32>,
    } else {
    }
    %c0 = arith.constant 0 : index
    %c0_1 = arith.constant 0 : index
    %3 = vector.load %arg3[%c0, %c0_1] : memref<8x128xf32, #tpu.memory_space<vmem>>, vector<8x128xf32>
    %c0_2 = arith.constant 0 : index
    %c0_3 = arith.constant 0 : index
    %4 = vector.load %arg2[%c0_2, %c0_3] : memref<8x128xf32, #tpu.memory_space<vmem>>, vector<8x128xf32>
    %5 = arith.subf %3, %4 : vector<8x128xf32>
    %6 = math.absf %5 : vector<8x128xf32>
    %cst = arith.constant 2.550000e+00 : f32
    %7 = vector.broadcast %cst : f32 to vector<8x128xf32>
    %8 = arith.subf %6, %7 : vector<8x128xf32>
    %cst_4 = arith.constant 0.000000e+00 : f32
    %9 = vector.broadcast %cst_4 : f32 to vector<8x128xf32>
    %10 = arith.maximumf %8, %9 : vector<8x128xf32>
    %11 = vector.shape_cast %6 : vector<8x128xf32> to vector<1x8x128xf32>
    %cst_5 = arith.constant dense<0.000000e+00> : vector<8x128xf32>
    %12 = vector.multi_reduction <add>, %11, %cst_5 [0] : vector<1x8x128xf32> to vector<8x128xf32>
    %13 = vector.shape_cast %10 : vector<8x128xf32> to vector<1x8x128xf32>
    %cst_6 = arith.constant dense<0.000000e+00> : vector<8x128xf32>
    %14 = vector.multi_reduction <add>, %13, %cst_6 [0] : vector<1x8x128xf32> to vector<8x128xf32>
    %c0_7 = arith.constant 0 : index
    %c0_8 = arith.constant 0 : index
    %c0_9 = arith.constant 0 : index
    %15 = vector.load %arg4[%c0_7, %c0_8, %c0_9] : memref<1x8x128xf32, #tpu.memory_space<vmem>>, vector<1x8x128xf32>
    %16 = vector.shape_cast %12 : vector<8x128xf32> to vector<1x8x128xf32>
    %17 = arith.addf %15, %16 : vector<1x8x128xf32>
    %c0_10 = arith.constant 0 : index
    %c0_11 = arith.constant 0 : index
    %c0_12 = arith.constant 0 : index
    %18 = vector.load %arg4[%c0_10, %c0_11, %c0_12] : memref<1x8x128xf32, #tpu.memory_space<vmem>>, vector<1x8x128xf32>
    tpu.vector_store %arg4[%c0_10, %c0_11, %c0_12], %17 {strides = array<i32>} : memref<1x8x128xf32, #tpu.memory_space<vmem>>, vector<1x8x128xf32>,
    %c0_13 = arith.constant 0 : index
    %c0_14 = arith.constant 0 : index
    %c0_15 = arith.constant 0 : index
    %19 = vector.load %arg5[%c0_13, %c0_14, %c0_15] : memref<1x8x128xf32, #tpu.memory_space<vmem>>, vector<1x8x128xf32>
    %20 = vector.shape_cast %14 : vector<8x128xf32> to vector<1x8x128xf32>
    %21 = arith.addf %19, %20 : vector<1x8x128xf32>
    %c0_16 = arith.constant 0 : index
    %c0_17 = arith.constant 0 : index
    %c0_18 = arith.constant 0 : index
    %22 = vector.load %arg5[%c0_16, %c0_17, %c0_18] : memref<1x8x128xf32, #tpu.memory_space<vmem>>, vector<1x8x128xf32>
    tpu.vector_store %arg5[%c0_16, %c0_17, %c0_18], %21 {strides = array<i32>} : memref<1x8x128xf32, #tpu.memory_space<vmem>>, vector<1x8x128xf32>,
    return
  }
  func.func @transform_0(%arg0: i32, %arg1: i32) -> (i32, i32) {
    %c1_i32 = arith.constant 1 : i32
    %0 = arith.muli %arg0, %c1_i32 : i32
    %1 = arith.addi %0, %arg1 : i32
    %c0_i32 = arith.constant 0 : i32
    %c0_i32_0 = arith.constant 0 : i32
    return %1, %c0_i32 : i32, i32
  }
  func.func @transform_1(%arg0: i32, %arg1: i32) -> (i32, i32) {
    %c1_i32 = arith.constant 1 : i32
    %0 = arith.muli %arg0, %c1_i32 : i32
    %1 = arith.addi %0, %arg1 : i32
    %c0_i32 = arith.constant 0 : i32
    %c0_i32_0 = arith.constant 0 : i32
    return %1, %c0_i32 : i32, i32
  }
  func.func @transform_2(%arg0: i32, %arg1: i32) -> (i32, i32, i32) {
    %c0_i32 = arith.constant 0 : i32
    %c0_i32_0 = arith.constant 0 : i32
    %c0_i32_1 = arith.constant 0 : i32
    return %arg0, %c0_i32, %c0_i32_0 : i32, i32, i32
  }
  func.func @transform_3(%arg0: i32, %arg1: i32) -> (i32, i32, i32) {
    %c0_i32 = arith.constant 0 : i32
    %c0_i32_0 = arith.constant 0 : i32
    %c0_i32_1 = arith.constant 0 : i32
    return %arg0, %c0_i32, %c0_i32_0 : i32, i32, i32
  }
}

</mosaic_0001>

<bundles_post_ra>
// kernel: tpu_custom_call.1
= control target key start
LH: loop header
LB: loop body
LE: loop exit
PB: predicated region body
PF: predicated region fallthrough
CT: control target
= control target key end

     0   :  { %9 = vsyncpa [#allocation3], 0  ;;  %s1004_s0 = inlined_call_operand.hbm [shape: f32[16,128], index: 0, kind: input, shape index: {}]   ;;  %s1005_s1 = inlined_call_operand.hbm [shape: f32[16,128], index: 1, kind: input, shape index: {}]   ;;  %s1006_s2 = inlined_call_operand.hbm [shape: f32[2,8,128], index: 2, kind: output, shape index: {0}]   ;;  %s1007_s3 = inlined_call_operand.hbm [shape: f32[2,8,128], index: 3, kind: output, shape index: {1}]  }
   0x1   :  { %11 = vsyncpa [#allocation3 + $0x1], 0 }
   0x2   :  { %12 = vsyncpa [#allocation6], 0 }
   0x3   :  { %14 = vsyncpa [#allocation6 + $0x1], 0 }
   0x4   :  { %15 = vsyncpa [#allocation4], 0 }
   0x5   :  { %17 = vsyncpa [#allocation4 + $0x1], 0 }
   0x6   :  { %18 = vsyncpa [#allocation9], 0 }
   0x7   :  { %20 = vsyncpa [#allocation9 + $0x1], 0  ;;  %s738_s12 = smov 0   ;;  %s740_s13 = smov 0  }
   0x8   :  { %s742_s14 = smov 0   ;;  %s744_s15 = smov 0  }
   0x9   :  { %s746_s16 = smov 0   ;;  %s748_s17 = smov 0  }
   0xa LB: > { %s441_s18 = sadd.s32 4294967295, %s712_s17   ;;  %s442_s19 = sadd.s32 4294967294, %s712_s17   ;;  %s712_s17 = sphi %s748_s17, %s26_s17   ;;  %s708_s16 = sphi %s746_s16, %s1027_s16   ;;  %s704_s15 = sphi %s744_s15, %s1026_s15   ;;  %s700_s14 = sphi %s742_s14, %s1025_s14   ;;  %s696_s13 = sphi %s740_s13, %s1024_s13   ;;  %s692_s12 = sphi %s738_s12, %s1023_s12  }
   0xb   : > { %s38_s20 = sadd.s32 1, %s708_s16  ;;  %s47_s21 = sadd.s32 1, %s700_s14 }
   0xc   : > { %p40_p0 = scmp.ge.s32.totalorder %s38_s20, 2  ;;  %p54_p1 = scmp.ne.s32.totalorder %s700_s14, %s696_s13 }
   0xd   : > { %p55_p2 = scmp.eq.s32.totalorder %s712_s17, 0  ;;  %p60_p3 = scmp.ne.s32.totalorder %s696_s13, %s692_s12 }
   0xe   : > { %s1029_s20 = smov (%p40_p0, %s38_s20), 0  ;;  %p61_p5 = scmp.eq.s32.totalorder %s441_s18, 0 }
   0xf   : > { %p779_p4 = por %p55_p2, %p54_p1  ;;  %s44_s23 = ssub.s32 %s708_s16, %s1029_s20 }
  0x10   : > { %p112_p6 = scmp.eq.s32.totalorder %s441_s18, 1  ;;  %p45_p7 = scmp.eq.s32.totalorder %s44_s23, 0 }
  0x11   : > { %p785_p8 = por %p61_p5, %p60_p3  ;;  %p118_p10 = scmp.eq.s32.totalorder %s442_s19, 1 }
  0x12   : > { %p789_p9 = por %p112_p6, %p54_p1  ;;  %p483_p13 = scmp.lt.s32.totalorder %s712_s17, 2 }
  0x13   : > { %s1011_s24 = scalar_select %p785_p8, 1, 0 }
  0x14   : > { %s1012_s25 = scalar_select %p789_p9, 1, 0 }
  0x15   : > { %s794_s26 = scalar_select %p45_p7, %s700_s14, %s47_s21  }
  0x16   : > { %p796_p11 = por %p118_p10, %p60_p3  ;;  %s803_s28 = sand.u32 1, %s700_s14  }
  0x17   : > { %s445_s29 = sshll.u32 %s803_s28, 3  ;;  %s446_s30 = sshll.u32 %s708_s16, 7 }
  0x18   : > { %s1013_s27 = scalar_select %p796_p11, 1, 0 }
  0x19   : > { %s812_s6 = scalar_lea.hbm %s1004_s0, %s446_s30  ;;  %s168_s7 = scalar_lea.vmem [#allocation2], %s445_s29 }
  0x1a   : > { %s176_s8 = sshll.u32 %s168_s7, 4  ;;  %p820_p0 = pnand %p483_p13, %p779_p4  ;;  %s816_s8 = int_to_ptr.vmem [resolvable:$true] %s176_s8 }
  0x1b   : > { %s165_s10 = scalar_lea.sflag [#allocation3], %s803_s28  ;;  %s534_s11 = scalar_lea.hbm %s812_s6, 128 }
  0x1c   : > { %p535_p3 = scmp.ne.s32.totalorder %s812_s6, %s534_s11  ;;  %p536_p5 = pneg %p820_p0 }
  0x1d   : > { %s539_s21 = scalar_lea.hbm %s1004_s0, 256  ;;  %p540_p4 = scmp.lt.u32.totalorder %s812_s6, %s1004_s0 }
  0x1e   : > { %p537_p6 = pnand %p536_p5, %p535_p3  ;;  %p541_p10 = scmp.lt.u32.totalorder %s539_s21, %s534_s11 }
  0x1f   : > { %p543_p12 = scmp.lt.u32.totalorder %s534_s11, %s812_s6 }
  0x20   : > { %p538_p7 = pneg %p537_p6  ;;  %p542_p13 = por %p541_p10, %p540_p4 }
  0x22   : > { %p544_p1 = por %p543_p12, %p542_p13 }
  0x24   : > { %p545_p2 = pnand %p544_p1, %p538_p7 }
  0x26   : > { %548 = shalt.err (!%p545_p2)
}
  0x27   : > { %s549_s4 = scalar_lea.vmem %s816_s8, 128  ;;  %s714_s5 = smov [#allocation2]  }
  0x28   : > { %p550_p3 = scmp.ne.s32.totalorder %s816_s8, %s549_s4  ;;  %s554_s7 = sshll.u32 %s714_s5, 4  ;;  %s555_s7 = int_to_ptr.vmem [resolvable:$false] %s554_s7 }
  0x29   : > { %s556_s18 = scalar_lea.vmem %s555_s7, 256  ;;  %p557_p9 = scmp.lt.s32.totalorder %s816_s8, %s555_s7 }
  0x2a   : > { %p552_p6 = pnand %p550_p3, %p536_p5  ;;  %p558_p4 = scmp.lt.s32.totalorder %s556_s18, %s549_s4 }
  0x2c   : > { %p553_p11 = pneg %p552_p6  ;;  %p559_p10 = por %p558_p4, %p557_p9 }
  0x2e   : > { %p560_p12 = pnand %p559_p10, %p553_p11 }
  0x30   : > { %563 = shalt.err (!%p560_p12)
}
  0x31   : > { %472 = dma.hbm_to_vmem [thread:$0]  (!%p820_p0), %s812_s6, 128, %s816_s8, %s165_s10  }
  0x32   : > { %p1015_p1 = scmp.lt.s32.totalorder %s712_s17, 3  ;;  %p1016_p2 = scmp.ge.s32.totalorder %s712_s17, 1 }
  0x33   : > { %s865_s22 = scalar_lea.hbm %s1005_s1, %s446_s30  ;;  %s187_s23 = scalar_lea.vmem [#allocation5], %s445_s29 }
  0x34   : > { %p856_p7 = pnand %p1016_p2, %p1015_p1  ;;  %s195_s4 = sshll.u32 %s187_s23, 4  ;;  %s196_s4 = int_to_ptr.vmem [resolvable:$true] %s195_s4 }
  0x35   : > { %s184_s6 = scalar_lea.sflag [#allocation6], %s803_s28  ;;  %s564_s8 = scalar_lea.hbm %s865_s22, 128 }
  0x36   : > { %s1017_s11 = scalar_select %p856_p7, 1, 0 }
  0x37   : > { %p565_p9 = scmp.ne.s32.totalorder %s865_s22, %s564_s8  ;;  %s569_s30 = scalar_lea.hbm %s1005_s1, 256 }
  0x38   : > { %p570_p3 = scmp.lt.u32.totalorder %s865_s22, %s1005_s1  ;;  %p571_p6 = scmp.lt.u32.totalorder %s569_s30, %s564_s8 }
  0x39   : > { %p567_p11 = pnand %p565_p9, %p536_p5  ;;  %p573_p10 = scmp.lt.u32.totalorder %s564_s8, %s865_s22 }
  0x3a   : > { %p572_p4 = por %p571_p6, %p570_p3 }
  0x3b   : > { %p568_p13 = pneg %p567_p11 }
  0x3c   : > { %p574_p12 = por %p573_p10, %p572_p4 }
  0x3e   : > { %p575_p1 = pnand %p574_p12, %p568_p13 }
  0x40   : > { %578 = shalt.err (!%p575_p1)
}
  0x41   : > { %s579_s28 = scalar_lea.vmem %s196_s4, 128  ;;  %s715_s29 = smov [#allocation5]  }
  0x42   : > { %p580_p2 = scmp.ne.s32.totalorder %s196_s4, %s579_s28  ;;  %s584_s19 = sshll.u32 %s715_s29, 4  ;;  %s585_s19 = int_to_ptr.vmem [resolvable:$false] %s584_s19 }
  0x43   : > { %s586_s21 = scalar_lea.vmem %s585_s19, 256  ;;  %p587_p8 = scmp.lt.s32.totalorder %s196_s4, %s585_s19 }
  0x44   : > { %p582_p9 = pnand %p580_p2, %p536_p5  ;;  %p588_p7 = scmp.lt.s32.totalorder %s586_s21, %s579_s28 }
  0x46   : > { %p583_p11 = pneg %p582_p9  ;;  %p589_p3 = por %p588_p7, %p587_p8 }
  0x48   : > { %p590_p6 = pnand %p589_p3, %p583_p11 }
  0x4a   : > { %593 = shalt.err (!%p590_p6)
}
  0x4b   : > { %475 = dma.hbm_to_vmem [thread:$0]  (!%p820_p0), %s865_s22, 128, %s196_s4, %s184_s6  }
  0x4c   : > { %p1018_p13 = scmp.ne.s32.totalorder %s1017_s11, 0 }
  0x4d   : > { %s892_s23 = sand.u32 (!%p1018_p13), 1, %s696_s13   ;;  %p1019_p8 = scmp.ne.s32.totalorder (!%p1018_p13), %s1011_s24, 0 }
  0x4e   : > { %204 = sbr.rel (%p1018_p13) target bundleno = 138 (0x8a), region = 28  ;;  %s895_s8 = sshll.u32 (!%p1018_p13), %s892_s23, 3 }
  0x4f   : > { %s207_s10 = scalar_lea.sflag (!%p1018_p13), [#allocation3], %s892_s23  ;;  %s210_s5 = scalar_lea.vmem (!%p1018_p13), [#allocation2], %s895_s8 }
  0x55   : > { %675 = dma.done.wait (%p1019_p8), %s207_s10, 128  }
  0x56   : > { %677 = vsyncadd (%p1019_p8), %s207_s10, 4294967168  ;;  %s216_s9 = scalar_lea.sflag [#allocation6], %s892_s23  ;;  %s219_s11 = scalar_lea.vmem [#allocation5], %s895_s8 }
  0x57   : > { %679 = dma.done.wait (%p1019_p8), %s216_s9, 128  }
  0x58   : > { %681 = vsyncadd (%p1019_p8), %s216_s9, 4294967168  ;;  %v260_v0 = vld [vmem:[%s219_s11] sm:$0xff]  ;;  %v261_v1 = vld [vmem:[%s210_s5] sm:$0xff]  ;;  %s457_s22 = sshll.u32 %s704_s15, 7  ;;  %s244_s4 = scalar_lea.vmem [#allocation7], %s895_s8 }
  0x59   : > { %v262_v2 = vsub.f32 %v260_v0, %v261_v1  ;;  %s293_s6 = sshll.u32 %s244_s4, 4  ;;  %s916_s24 = scalar_lea.hbm %s1006_s2, %s457_s22  ;;  %s918_s6 = int_to_ptr.vmem [resolvable:$true] %s293_s6 }
  0x5a   : > { %s251_s18 = scalar_lea.vmem [#allocation8], %s895_s8  ;;  %s275_s29 = scalar_lea.sflag [#allocation4], %s892_s23 }
  0x5b   : > { %v263_v3 = vand.u32 2147483647, %v262_v2  ;;  %s923_s28 = sshll.u32 %s251_s18, 4  ;;  %s594_s19 = scalar_lea.vmem %s918_s6, 128  ;;  %s955_s28 = int_to_ptr.vmem [resolvable:$true] %s923_s28 }
  0x5c   : > { %p595_p0 = scmp.ne.s32.totalorder %s918_s6, %s594_s19  ;;  %p1020_p5 = scmp.ne.s32.totalorder %s1012_s25, 0 }
  0x5d   : > { %v454_v4 = vadd.f32 -2.55, %v263_v3  ;;  %270 = vst [vmem:[%s244_s4] sm:$0xff] %v263_v3  ;;  %s716_s21 = smov [#allocation7]  }
  0x5e   : > { %p596_p7 = pnand %p595_p0, %p1020_p5  ;;  %s598_s10 = sshll.u32 %s716_s21, 4  ;;  %s599_s10 = int_to_ptr.vmem [resolvable:$false] %s598_s10 }
  0x5f   : > { %v265_v5 = vmax.f32 %v454_v4, 0.0  ;;  %s600_s5 = scalar_lea.vmem %s599_s10, 256  ;;  %p601_p10 = scmp.lt.s32.totalorder %s918_s6, %s599_s10 }
  0x60   : > { %p597_p4 = pneg %p596_p7  ;;  %p602_p12 = scmp.lt.s32.totalorder %s600_s5, %s594_s19 }
  0x62   : > { %p603_p1 = por %p602_p12, %p601_p10 }
  0x64   : > { %p604_p2 = pnand %p603_p1, %p597_p4 }
  0x66   : > { %607 = shalt.err (!%p604_p2)
}
  0x67   : > { %s608_s9 = scalar_lea.hbm %s916_s24, 128  ;;  %s612_s30 = scalar_lea.hbm %s1006_s2, 256 }
  0x68   : > { %p609_p9 = scmp.ne.s32.totalorder %s916_s24, %s608_s9  ;;  %p613_p6 = scmp.lt.u32.totalorder %s916_s24, %s1006_s2 }
  0x69   : > { %p614_p13 = scmp.lt.u32.totalorder %s612_s30, %s608_s9  ;;  %p616_p0 = scmp.lt.u32.totalorder %s608_s9, %s916_s24 }
  0x6a   : > { %p610_p11 = pnand %p609_p9, %p1020_p5 }
  0x6b   : > { %p615_p8 = por %p614_p13, %p613_p6 }
  0x6c   : > { %p611_p3 = pneg %p610_p11 }
  0x6d   : > { %p617_p7 = por %p616_p0, %p615_p8 }
  0x6f   : > { %p618_p4 = pnand %p617_p7, %p611_p3 }
  0x71   : > { %621 = shalt.err (!%p618_p4)
}
  0x72   : > { %465 = dma.vmem_to_hbm [thread:$0]  (%p1020_p5), %s918_s6, 128, %s916_s24, %s275_s29   ;;  %273 = vst [vmem:[%s251_s18] sm:$0xff] %v265_v5 }
  0x73   : > { %s952_s5 = scalar_lea.hbm %s1007_s3, %s457_s22  ;;  %s280_s9 = scalar_lea.sflag [#allocation9], %s892_s23 }
  0x74   : > { %s622_s11 = scalar_lea.vmem %s955_s28, 128  ;;  %s717_s6 = smov [#allocation8]  }
  0x75   : > { %p623_p10 = scmp.ne.s32.totalorder %s955_s28, %s622_s11  ;;  %s626_s15 = sshll.u32 %s717_s6, 4  ;;  %s627_s15 = int_to_ptr.vmem [resolvable:$false] %s626_s15 }
  0x76   : > { %s628_s24 = scalar_lea.vmem %s627_s15, 256  ;;  %p629_p2 = scmp.lt.s32.totalorder %s955_s28, %s627_s15 }
  0x77   : > { %p624_p12 = pnand %p623_p10, %p1020_p5  ;;  %p630_p9 = scmp.lt.s32.totalorder %s628_s24, %s622_s11 }
  0x79   : > { %p625_p1 = pneg %p624_p12  ;;  %p631_p11 = por %p630_p9, %p629_p2 }
  0x7b   : > { %p632_p3 = pnand %p631_p11, %p625_p1 }
  0x7d   : > { %635 = shalt.err (!%p632_p3)
}
  0x7e   : > { %s636_s23 = scalar_lea.hbm %s952_s5, 128  ;;  %s640_s18 = scalar_lea.hbm %s1007_s3, 256 }
  0x7f   : > { %p637_p6 = scmp.ne.s32.totalorder %s952_s5, %s636_s23  ;;  %p641_p0 = scmp.lt.u32.totalorder %s952_s5, %s1007_s3 }
  0x80   : > { %p642_p7 = scmp.lt.u32.totalorder %s640_s18, %s636_s23  ;;  %p644_p10 = scmp.lt.u32.totalorder %s636_s23, %s952_s5 }
  0x81   : > { %p638_p13 = pnand %p637_p6, %p1020_p5 }
  0x82   : > { %p643_p4 = por %p642_p7, %p641_p0 }
  0x83   : > { %p639_p8 = pneg %p638_p13 }
  0x84   : > { %p645_p12 = por %p644_p10, %p643_p4 }
  0x86   : > { %p646_p1 = pnand %p645_p12, %p639_p8 }
  0x88   : > { %649 = shalt.err (!%p646_p1)
}
  0x89   : > { %466 = dma.vmem_to_hbm [thread:$0]  (%p1020_p5), %s955_s28, 128, %s952_s5, %s280_s9  }
  0x8a PF: > { %s318_s30 = sand.u32 1, %s692_s12   ;;  %p1021_p2 = scmp.ne.s32.totalorder %s1013_s27, 0 }
  0x8b   : > { %p1022_p9 = scmp.ge.s32.totalorder %s712_s17, 2  ;;  %s319_s7 = scalar_lea.sflag [#allocation4], %s318_s30 }
  0x8d   : > { %p477_p11 = pnand %p1022_p9, %p1021_p2 }
  0x8f   : > { %683 = dma.done.wait (!%p477_p11), %s319_s7, 128  }
  0x90   : > { %685 = vsyncadd (!%p477_p11), %s319_s7, 4294967168  ;;  %s328_s21 = scalar_lea.sflag [#allocation9], %s318_s30 }
  0x91   : > { %687 = dma.done.wait (!%p477_p11), %s328_s21, 128  }
  0x92   : > { %689 = vsyncadd (!%p477_p11), %s328_s21, 4294967168  ;;  %s26_s17 = sadd.s32 1, %s712_s17   ;;  %s1023_s12 = smov %s696_s13 }
  0x93   : > { %p23_p3 = scmp.ge.s32.totalorder %s26_s17, 4   ;;  %s1024_s13 = smov %s700_s14 }
  0x94   : > { %s1025_s14 = smov %s794_s26  ;;  %s1026_s15 = smov %s708_s16 }
  0x95   : > { %s1027_s16 = smov %s1029_s20  ;;  %25 = sbr.rel (!%p23_p3) target bundleno = 10 (0xa), region = 107 }
  0x9c   :  { %333 = vsyncpa [#allocation3], 1 }
  0x9d   :  { %335 = vsyncpa [#allocation3 + $0x1], 1 }
  0x9e   :  { %336 = vsyncpa [#allocation6], 1 }
  0x9f   :  { %338 = vsyncpa [#allocation6 + $0x1], 1 }
  0xa0   :  { %339 = vsyncpa [#allocation4], 1 }
  0xa1   :  { %341 = vsyncpa [#allocation4 + $0x1], 1 }
  0xa2   :  { %342 = vsyncpa [#allocation9], 1 }
  0xa3   :  { %344 = vsyncpa [#allocation9 + $0x1], 1 }

</bundles_post_ra>
